<compile_context>
chip_gen: v7x
topology: tpu7x:2x2x1
jax: 0.10.0
libtpu: 0.0.40
codegen_flags: <defaults>
</compile_context>

<pallas_src>
import functools

import jax
import jax.numpy as jnp
import numpy as np
from jax.experimental import pallas as pl
from jax.experimental.pallas import tpu as pltpu

KH = KW = 3  # kernel_size = 3


def _round_up(x, m):
    return ((x + m - 1) // m) * m


def conv_tap_kernel(xc_ref, xh_ref, w_ref, b_ref, o_ref, *, offsets, tile):
    """One spatial tile of the 3x3 conv in flat padded-width layout.

    xc_ref: (C_in, tile)      current lane tile of the flat padded input
    xh_ref: (C_in, halo_pad)  halo chunk immediately following the tile
    w_ref : (9, C_out, C_in)  per-tap folded weights
    b_ref : (C_out, 1)        bias, already f32
    o_ref : (C_out, tile)     lane-dense output slab
    """
    # Stitch tile + halo (128-aligned boundary), compute in f32.
    x = jnp.concatenate([xc_ref[...], xh_ref[...]], axis=-1).astype(jnp.float32)
    acc = None
    for k, off in enumerate(offsets):
        w_k = w_ref[k].astype(jnp.float32)          # (C_out, C_in)
        tap = x[:, off:off + tile]                  # static lane-offset slice
        part = jnp.dot(w_k, tap, preferred_element_type=jnp.float32)
        acc = part if acc is None else acc + part
    o_ref[...] = (acc + b_ref[...]).astype(o_ref.dtype)


def conv_subpixel(x, weight, bias, scale_factor=2, *,
                  compute_dtype=jnp.bfloat16, max_tile=None,
                  vmem_budget_bytes=12 * 1024 * 1024):
    """x: (N, C_in, H, W); weight: (C_out_total, C_in, 3, 3) PyTorch OIHW;
    bias: (C_out_total,).  Returns NCHW (N, out_c, H*r, W*r)."""
    N, C_in, H, W = x.shape
    C_out = weight.shape[0]
    r = scale_factor
    out_c = C_out // (r * r)

    # --- flat padded-width layout ------------------------------------------
    # Output position (h, w) lives at flat index l = h*(W+2) + w of the padded
    # image; tap (kh, kw) is then the element at l + kh*(W+2) + kw.  Columns
    # w in {W, W+1} are garbage and are sliced off in the wrapper.
    Wp = W + 2
    L_out = H * Wp
    halo = 2 * Wp + 2
    halo_pad = _round_up(halo, 128)

    # --- tile size from a VMEM budget (double-buffered in/out + f32 temps) --
    in_b = jnp.dtype(compute_dtype).itemsize
    out_b = jnp.dtype(x.dtype).itemsize
    per_lane = 2 * C_in * in_b + 2 * C_out * out_b + 4 * (2 * C_in + C_out)
    t_cap = min(max(halo_pad, vmem_budget_bytes // per_lane), 16384)
    if max_tile is not None:
        t_cap = min(t_cap, max_tile)
    T = max(halo_pad, (t_cap // halo_pad) * halo_pad)   # multiple of halo_pad
    T = min(T, _round_up(L_out, halo_pad))
    num_t = pl.cdiv(L_out, T)
    L_main = num_t * T
    L_total = L_main + halo_pad
    hstep = T // halo_pad

    # --- wrapper-side layout glue (≈1x raw input traffic, no 9x im2col) -----
    x_pad = jnp.pad(x, ((0, 0), (0, 0), (1, 1), (1, 1)))        # (N,C_in,H+2,W+2)
    F = x_pad.reshape(N, C_in, (H + 2) * Wp).astype(compute_dtype)
    F = jnp.pad(F, ((0, 0), (0, 0), (0, L_total - (H + 2) * Wp)))

    # Weights OIHW -> (9, C_out, C_in), tap order k = kh*3 + kw.
    w9 = jnp.transpose(weight.reshape(C_out, C_in, KH * KW), (2, 0, 1))
    w9 = w9.astype(compute_dtype)
    b_col = bias.astype(jnp.float32).reshape(C_out, 1)
    offsets = tuple(kh * Wp + kw for kh in range(KH) for kw in range(KW))

    conv_flat = pl.pallas_call(
        functools.partial(conv_tap_kernel, offsets=offsets, tile=T),
        out_shape=jax.ShapeDtypeStruct((N, C_out, L_main), x.dtype),
        grid_spec=pltpu.PrefetchScalarGridSpec(
            num_scalar_prefetch=0,
            grid=(num_t, N),
            in_specs=[
                # current tile of the flat padded input
                pl.BlockSpec((None, C_in, T), lambda t, n: (n, 0, t)),
                # halo chunk right after the tile (same array, second view)
                pl.BlockSpec((None, C_in, halo_pad),
                             lambda t, n: (n, 0, (t + 1) * hstep)),
                # folded weights + bias (resident)
                pl.BlockSpec((KH * KW, C_out, C_in), lambda t, n: (0, 0, 0)),
                pl.BlockSpec((C_out, 1), lambda t, n: (0, 0)),
            ],
            out_specs=pl.BlockSpec((None, C_out, T), lambda t, n: (n, 0, t)),
        ),
        compiler_params=pltpu.CompilerParams(
            dimension_semantics=("parallel", "parallel"),
            vmem_limit_bytes=32 * 1024 * 1024),
    )(F, F, w9, b_col)

    # --- glue: drop padded lanes / padded-width columns, then PixelShuffle --
    conv = conv_flat[:, :, :L_out].reshape(N, C_out, H, Wp)[:, :, :, :W]
    # PyTorch: out[n, c, h*r+i, w*r+j] = conv[n, c*r*r + i*r + j, h, w]
    y = conv.reshape(N, out_c, r, r, H, W)
    y = jnp.transpose(y, (0, 1, 4, 2, 5, 3))
    return y.reshape(N, out_c, H * r, W * r)


def reference(x, weight, bias, scale_factor=2):
    """Pure-JAX reference reproducing PyTorch Conv2d + PixelShuffle."""
    out = jax.lax.conv_general_dilated(
        x, weight, window_strides=(1, 1), padding=((1, 1), (1, 1)),
        dimension_numbers=("NCHW", "OIHW", "NCHW"))
    out = out + bias.reshape(1, -1, 1, 1)
    N, C, H, W = out.shape
    r = scale_factor
    oc = C // (r * r)
    y = out.reshape(N, oc, r, r, H, W)
    y = jnp.transpose(y, (0, 1, 4, 2, 5, 3))
    return y.reshape(N, oc, H * r, W * r)


if __name__ == "__main__":
    key = jax.random.PRNGKey(0)
    k1, k2, k3 = jax.random.split(key, 3)

    # Small shapes consistent with the module's forward.
    N, in_c, H, W = 2, 4, 16, 16
    out_c, scale = 4, 2
    c_out_total = out_c * scale ** 2  # conv output channels = out_c * r^2 = 16

    x = jax.random.normal(k1, (N, in_c, H, W), jnp.float32)
    weight = jax.random.normal(k2, (c_out_total, in_c, KH, KW), jnp.float32) * 0.1
    bias = jax.random.normal(k3, (c_out_total,), jnp.float32) * 0.1

    y_ref = reference(x, weight, bias, scale)

    # Default bf16 input-stream path (HBM-traffic optimized).
    y = jax.block_until_ready(conv_subpixel(x, weight, bias, scale))
    assert y.shape == (N, out_c, H * scale, W * scale)
    assert np.allclose(np.asarray(y), np.asarray(y_ref), atol=5e-2, rtol=5e-2)

    # f32 compute path: tight numerical check of the kernel math.
    y32 = jax.block_until_ready(
        conv_subpixel(x, weight, bias, scale, compute_dtype=jnp.float32))
    assert np.allclose(np.asarray(y32), np.asarray(y_ref), atol=1e-4, rtol=1e-4)

    # Multi-tile / non-128-divisible spatial / N=1 path (exercises halo reads,
    # padded-lane masking-by-slicing, and megacore-style grid with N=1).
    k4, k5, k6 = jax.random.split(jax.random.PRNGKey(1), 3)
    N2, in2, H2, W2, oc2 = 1, 3, 20, 24, 2
    co2 = oc2 * scale ** 2
    x2 = jax.random.normal(k4, (N2, in2, H2, W2), jnp.float32)
    w2 = jax.random.normal(k5, (co2, in2, KH, KW), jnp.float32) * 0.1
    b2 = jax.random.normal(k6, (co2,), jnp.float32) * 0.1
    y2 = jax.block_until_ready(
        conv_subpixel(x2, w2, b2, scale, compute_dtype=jnp.float32, max_tile=256))
    y2_ref = reference(x2, w2, b2, scale)
    assert y2.shape == (N2, oc2, H2 * scale, W2 * scale)
    assert np.allclose(np.asarray(y2), np.asarray(y2_ref), atol=1e-4, rtol=1e-4)

    print("KERNEL_OK")
</pallas_src>

<mosaic_0001>
module attributes {stable_mosaic.version = 11 : i64} {
  func.func @conv_tap_kernel(%arg0: i32, %arg1: i32, %arg2: memref<1x4x384xbf16, #tpu.memory_space<vmem>>, %arg3: memref<1x4x128xbf16, #tpu.memory_space<vmem>>, %arg4: memref<9x16x4xbf16, #tpu.memory_space<vmem>>, %arg5: memref<16x1xf32, #tpu.memory_space<vmem>>, %arg6: memref<1x16x384xf32, #tpu.memory_space<vmem>>) attributes {dimension_semantics = [#tpu.dimension_semantics<parallel>, #tpu.dimension_semantics<parallel>], iteration_bounds = array<i64: 1, 2>, scalar_prefetch = 0 : i64, scratch_operands = 0 : i64, tpu.core_type = #tpu.core_type<tc>, window_params = [{transform_indices = @transform_0, window_bounds = array<i64: 1, 4, 384>}, {transform_indices = @transform_1, window_bounds = array<i64: 1, 4, 128>}, {pipeline_mode = #tpu.pipeline_mode<synchronous>, transform_indices = @transform_2, window_bounds = array<i64: 9, 16, 4>}, {pipeline_mode = #tpu.pipeline_mode<synchronous>, transform_indices = @transform_3, window_bounds = array<i64: 16, 1>}, {transform_indices = @transform_4, window_bounds = array<i64: 1, 16, 384>}]} {
    %c0 = arith.constant 0 : index
    %c0_0 = arith.constant 0 : index
    %c0_1 = arith.constant 0 : index
    %0 = vector.load %arg2[%c0, %c0_0, %c0_1] : memref<1x4x384xbf16, #tpu.memory_space<vmem>>, vector<1x4x384xbf16>
    %1 = vector.shape_cast %0 : vector<1x4x384xbf16> to vector<4x384xbf16>
    %c0_2 = arith.constant 0 : index
    %c0_3 = arith.constant 0 : index
    %c0_4 = arith.constant 0 : index
    %2 = vector.load %arg3[%c0_2, %c0_3, %c0_4] : memref<1x4x128xbf16, #tpu.memory_space<vmem>>, vector<1x4x128xbf16>
    %3 = vector.shape_cast %2 : vector<1x4x128xbf16> to vector<4x128xbf16>
    %4 = tpu.concatenate %1, %3 in 1 : vector<4x384xbf16>, vector<4x128xbf16> -> vector<4x512xbf16>
    %5 = arith.extf %4 : vector<4x512xbf16> to vector<4x512xf32>
    %c0_5 = arith.constant 0 : index
    %c0_6 = arith.constant 0 : index
    %c0_7 = arith.constant 0 : index
    %6 = vector.load %arg4[%c0_5, %c0_6, %c0_7] : memref<9x16x4xbf16, #tpu.memory_space<vmem>>, vector<1x16x4xbf16>
    %7 = vector.shape_cast %6 : vector<1x16x4xbf16> to vector<16x4xbf16>
    %8 = arith.extf %7 : vector<16x4xbf16> to vector<16x4xf32>
    %9 = vector.extract_strided_slice %5 {offsets = [0, 0], sizes = [4, 384], strides = [1, 1]} : vector<4x512xf32> to vector<4x384xf32>
    %cst = arith.constant dense<0.000000e+00> : vector<16x384xf32>
    %10 = tpu.matmul %8, %9, %cst {dimension_numbers = #tpu.dot_dimension_numbers<[1], [0], [0], [1], [0, 0, 1, 1], [], []>} : vector<16x4xf32>, vector<4x384xf32>, vector<16x384xf32> -> vector<16x384xf32>
    %c1 = arith.constant 1 : index
    %c0_8 = arith.constant 0 : index
    %c0_9 = arith.constant 0 : index
    %11 = vector.load %arg4[%c1, %c0_8, %c0_9] : memref<9x16x4xbf16, #tpu.memory_space<vmem>>, vector<1x16x4xbf16>
    %12 = vector.shape_cast %11 : vector<1x16x4xbf16> to vector<16x4xbf16>
    %13 = arith.extf %12 : vector<16x4xbf16> to vector<16x4xf32>
    %14 = vector.extract_strided_slice %5 {offsets = [0, 1], sizes = [4, 384], strides = [1, 1]} : vector<4x512xf32> to vector<4x384xf32>
    %cst_10 = arith.constant dense<0.000000e+00> : vector<16x384xf32>
    %15 = tpu.matmul %13, %14, %cst_10 {dimension_numbers = #tpu.dot_dimension_numbers<[1], [0], [0], [1], [0, 0, 1, 1], [], []>} : vector<16x4xf32>, vector<4x384xf32>, vector<16x384xf32> -> vector<16x384xf32>
    %16 = arith.addf %10, %15 : vector<16x384xf32>
    %c2 = arith.constant 2 : index
    %c0_11 = arith.constant 0 : index
    %c0_12 = arith.constant 0 : index
    %17 = vector.load %arg4[%c2, %c0_11, %c0_12] : memref<9x16x4xbf16, #tpu.memory_space<vmem>>, vector<1x16x4xbf16>
    %18 = vector.shape_cast %17 : vector<1x16x4xbf16> to vector<16x4xbf16>
    %19 = arith.extf %18 : vector<16x4xbf16> to vector<16x4xf32>
    %20 = vector.extract_strided_slice %5 {offsets = [0, 2], sizes = [4, 384], strides = [1, 1]} : vector<4x512xf32> to vector<4x384xf32>
    %cst_13 = arith.constant dense<0.000000e+00> : vector<16x384xf32>
    %21 = tpu.matmul %19, %20, %cst_13 {dimension_numbers = #tpu.dot_dimension_numbers<[1], [0], [0], [1], [0, 0, 1, 1], [], []>} : vector<16x4xf32>, vector<4x384xf32>, vector<16x384xf32> -> vector<16x384xf32>
    %22 = arith.addf %16, %21 : vector<16x384xf32>
    %c3 = arith.constant 3 : index
    %c0_14 = arith.constant 0 : index
    %c0_15 = arith.constant 0 : index
    %23 = vector.load %arg4[%c3, %c0_14, %c0_15] : memref<9x16x4xbf16, #tpu.memory_space<vmem>>, vector<1x16x4xbf16>
    %24 = vector.shape_cast %23 : vector<1x16x4xbf16> to vector<16x4xbf16>
    %25 = arith.extf %24 : vector<16x4xbf16> to vector<16x4xf32>
    %26 = vector.extract_strided_slice %5 {offsets = [0, 18], sizes = [4, 384], strides = [1, 1]} : vector<4x512xf32> to vector<4x384xf32>
    %cst_16 = arith.constant dense<0.000000e+00> : vector<16x384xf32>
    %27 = tpu.matmul %25, %26, %cst_16 {dimension_numbers = #tpu.dot_dimension_numbers<[1], [0], [0], [1], [0, 0, 1, 1], [], []>} : vector<16x4xf32>, vector<4x384xf32>, vector<16x384xf32> -> vector<16x384xf32>
    %28 = arith.addf %22, %27 : vector<16x384xf32>
    %c4 = arith.constant 4 : index
    %c0_17 = arith.constant 0 : index
    %c0_18 = arith.constant 0 : index
    %29 = vector.load %arg4[%c4, %c0_17, %c0_18] : memref<9x16x4xbf16, #tpu.memory_space<vmem>>, vector<1x16x4xbf16>
    %30 = vector.shape_cast %29 : vector<1x16x4xbf16> to vector<16x4xbf16>
    %31 = arith.extf %30 : vector<16x4xbf16> to vector<16x4xf32>
    %32 = vector.extract_strided_slice %5 {offsets = [0, 19], sizes = [4, 384], strides = [1, 1]} : vector<4x512xf32> to vector<4x384xf32>
    %cst_19 = arith.constant dense<0.000000e+00> : vector<16x384xf32>
    %33 = tpu.matmul %31, %32, %cst_19 {dimension_numbers = #tpu.dot_dimension_numbers<[1], [0], [0], [1], [0, 0, 1, 1], [], []>} : vector<16x4xf32>, vector<4x384xf32>, vector<16x384xf32> -> vector<16x384xf32>
    %34 = arith.addf %28, %33 : vector<16x384xf32>
    %c5 = arith.constant 5 : index
    %c0_20 = arith.constant 0 : index
    %c0_21 = arith.constant 0 : index
    %35 = vector.load %arg4[%c5, %c0_20, %c0_21] : memref<9x16x4xbf16, #tpu.memory_space<vmem>>, vector<1x16x4xbf16>
    %36 = vector.shape_cast %35 : vector<1x16x4xbf16> to vector<16x4xbf16>
    %37 = arith.extf %36 : vector<16x4xbf16> to vector<16x4xf32>
    %38 = vector.extract_strided_slice %5 {offsets = [0, 20], sizes = [4, 384], strides = [1, 1]} : vector<4x512xf32> to vector<4x384xf32>
    %cst_22 = arith.constant dense<0.000000e+00> : vector<16x384xf32>
    %39 = tpu.matmul %37, %38, %cst_22 {dimension_numbers = #tpu.dot_dimension_numbers<[1], [0], [0], [1], [0, 0, 1, 1], [], []>} : vector<16x4xf32>, vector<4x384xf32>, vector<16x384xf32> -> vector<16x384xf32>
    %40 = arith.addf %34, %39 : vector<16x384xf32>
    %c6 = arith.constant 6 : index
    %c0_23 = arith.constant 0 : index
    %c0_24 = arith.constant 0 : index
    %41 = vector.load %arg4[%c6, %c0_23, %c0_24] : memref<9x16x4xbf16, #tpu.memory_space<vmem>>, vector<1x16x4xbf16>
    %42 = vector.shape_cast %41 : vector<1x16x4xbf16> to vector<16x4xbf16>
    %43 = arith.extf %42 : vector<16x4xbf16> to vector<16x4xf32>
    %44 = vector.extract_strided_slice %5 {offsets = [0, 36], sizes = [4, 384], strides = [1, 1]} : vector<4x512xf32> to vector<4x384xf32>
    %cst_25 = arith.constant dense<0.000000e+00> : vector<16x384xf32>
    %45 = tpu.matmul %43, %44, %cst_25 {dimension_numbers = #tpu.dot_dimension_numbers<[1], [0], [0], [1], [0, 0, 1, 1], [], []>} : vector<16x4xf32>, vector<4x384xf32>, vector<16x384xf32> -> vector<16x384xf32>
    %46 = arith.addf %40, %45 : vector<16x384xf32>
    %c7 = arith.constant 7 : index
    %c0_26 = arith.constant 0 : index
    %c0_27 = arith.constant 0 : index
    %47 = vector.load %arg4[%c7, %c0_26, %c0_27] : memref<9x16x4xbf16, #tpu.memory_space<vmem>>, vector<1x16x4xbf16>
    %48 = vector.shape_cast %47 : vector<1x16x4xbf16> to vector<16x4xbf16>
    %49 = arith.extf %48 : vector<16x4xbf16> to vector<16x4xf32>
    %50 = vector.extract_strided_slice %5 {offsets = [0, 37], sizes = [4, 384], strides = [1, 1]} : vector<4x512xf32> to vector<4x384xf32>
    %cst_28 = arith.constant dense<0.000000e+00> : vector<16x384xf32>
    %51 = tpu.matmul %49, %50, %cst_28 {dimension_numbers = #tpu.dot_dimension_numbers<[1], [0], [0], [1], [0, 0, 1, 1], [], []>} : vector<16x4xf32>, vector<4x384xf32>, vector<16x384xf32> -> vector<16x384xf32>
    %52 = arith.addf %46, %51 : vector<16x384xf32>
    %c8 = arith.constant 8 : index
    %c0_29 = arith.constant 0 : index
    %c0_30 = arith.constant 0 : index
    %53 = vector.load %arg4[%c8, %c0_29, %c0_30] : memref<9x16x4xbf16, #tpu.memory_space<vmem>>, vector<1x16x4xbf16>
    %54 = vector.shape_cast %53 : vector<1x16x4xbf16> to vector<16x4xbf16>
    %55 = arith.extf %54 : vector<16x4xbf16> to vector<16x4xf32>
    %56 = vector.extract_strided_slice %5 {offsets = [0, 38], sizes = [4, 384], strides = [1, 1]} : vector<4x512xf32> to vector<4x384xf32>
    %cst_31 = arith.constant dense<0.000000e+00> : vector<16x384xf32>
    %57 = tpu.matmul %55, %56, %cst_31 {dimension_numbers = #tpu.dot_dimension_numbers<[1], [0], [0], [1], [0, 0, 1, 1], [], []>} : vector<16x4xf32>, vector<4x384xf32>, vector<16x384xf32> -> vector<16x384xf32>
    %58 = arith.addf %52, %57 : vector<16x384xf32>
    %c0_32 = arith.constant 0 : index
    %c0_33 = arith.constant 0 : index
    %59 = vector.load %arg5[%c0_32, %c0_33] : memref<16x1xf32, #tpu.memory_space<vmem>>, vector<16x1xf32>
    %60 = vector.broadcast %59 : vector<16x1xf32> to vector<16x384xf32>
    %61 = arith.addf %58, %60 : vector<16x384xf32>
    %c0_34 = arith.constant 0 : index
    %c0_35 = arith.constant 0 : index
    %c0_36 = arith.constant 0 : index
    %62 = vector.load %arg6[%c0_34, %c0_35, %c0_36] : memref<1x16x384xf32, #tpu.memory_space<vmem>>, vector<1x16x384xf32>
    %63 = vector.shape_cast %62 : vector<1x16x384xf32> to vector<16x384xf32>
    %64 = vector.shape_cast %61 : vector<16x384xf32> to vector<1x16x384xf32>
    tpu.vector_store %arg6[%c0_34, %c0_35, %c0_36], %64 {strides = array<i32>} : memref<1x16x384xf32, #tpu.memory_space<vmem>>, vector<1x16x384xf32>,
    return
  }
  func.func @transform_0(%arg0: i32, %arg1: i32) -> (i32, i32, i32) {
    %c0_i32 = arith.constant 0 : i32
    %c0_i32_0 = arith.constant 0 : i32
    return %arg1, %c0_i32, %arg0 : i32, i32, i32
  }
  func.func @transform_1(%arg0: i32, %arg1: i32) -> (i32, i32, i32) {
    %c1_i32 = arith.constant 1 : i32
    %0 = arith.addi %arg0, %c1_i32 : i32
    %c3_i32 = arith.constant 3 : i32
    %1 = arith.muli %0, %c3_i32 : i32
    %c0_i32 = arith.constant 0 : i32
    %c0_i32_0 = arith.constant 0 : i32
    return %arg1, %c0_i32, %1 : i32, i32, i32
  }
  func.func @transform_2(%arg0: i32, %arg1: i32) -> (i32, i32, i32) {
    %c0_i32 = arith.constant 0 : i32
    %c0_i32_0 = arith.constant 0 : i32
    %c0_i32_1 = arith.constant 0 : i32
    %c0_i32_2 = arith.constant 0 : i32
    return %c0_i32, %c0_i32_0, %c0_i32_1 : i32, i32, i32
  }
  func.func @transform_3(%arg0: i32, %arg1: i32) -> (i32, i32) {
    %c0_i32 = arith.constant 0 : i32
    %c0_i32_0 = arith.constant 0 : i32
    %c0_i32_1 = arith.constant 0 : i32
    return %c0_i32, %c0_i32_0 : i32, i32
  }
  func.func @transform_4(%arg0: i32, %arg1: i32) -> (i32, i32, i32) {
    %c0_i32 = arith.constant 0 : i32
    %c0_i32_0 = arith.constant 0 : i32
    return %arg1, %c0_i32, %arg0 : i32, i32, i32
  }
}

</mosaic_0001>

<bundles_post_ra>
// kernel: tpu_custom_call.1
= control target key start
LH: loop header
LB: loop body
LE: loop exit
PB: predicated region body
PF: predicated region fallthrough
CT: control target
= control target key end

     0   :  { %9 = vsyncpa [#allocation3], 0  ;;  %s2955_s0 = inlined_call_operand.vmem [shape: bf16[2,4,512], index: 0, kind: input, shape index: {}]   ;;  %s2956_s1 = inlined_call_operand.vmem [shape: bf16[2,4,512], index: 1, kind: input, shape index: {}]   ;;  %s2957_s2 = inlined_call_operand.vmem [shape: bf16[9,16,4], index: 2, kind: input, shape index: {}]   ;;  %s2958_s3 = inlined_call_operand.vmem [shape: f32[16,1], index: 3, kind: input, shape index: {}]   ;;  %s2959_s4 = inlined_call_operand.hbm [shape: f32[2,16,384], index: 4, kind: output, shape index: {}]  }
   0x1   :  { %11 = vsyncpa [#allocation3 + $0x1], 0  ;;  %s2610_s15 = smov 0   ;;  %s2612_s16 = smov 0  }
   0x2   :  { %s2614_s17 = smov 0   ;;  %s2616_s18 = smov 0  }
   0x3   :  { %s2618_s19 = smov 0   ;;  %s2620_s20 = smov 0  }
   0x4 LB: > { %s2119_s21 = sadd.s32 4294967295, %s2569_s20   ;;  %s2120_s22 = sadd.s32 4294967294, %s2569_s20   ;;  %s2569_s20 = sphi %s2620_s20, %s17_s20   ;;  %s2565_s19 = sphi %s2618_s19, %s2966_s19   ;;  %s2561_s18 = sphi %s2616_s18, %s2965_s18   ;;  %s2557_s17 = sphi %s2614_s17, %s2964_s17   ;;  %s2553_s16 = sphi %s2612_s16, %s2963_s16   ;;  %s2549_s15 = sphi %s2610_s15, %s2962_s15  }
   0x5   : > { %s26_s23 = sadd.s32 1, %s2565_s19  ;;  %s140_s24 = sadd.s32 1, %s2557_s17 }
   0x6   : > { %p27_p0 = scmp.ge.s32.totalorder %s26_s23, 2  ;;  %p150_p1 = scmp.ne.s32.totalorder %s2557_s17, %s2553_s16 }
   0x7   : > { %p151_p2 = scmp.eq.s32.totalorder %s2119_s21, 1  ;;  %p156_p3 = scmp.ne.s32.totalorder %s2553_s16, %s2549_s15 }
   0x8   : > { %s2968_s23 = smov (%p27_p0, %s26_s23), 0  ;;  %p157_p5 = scmp.eq.s32.totalorder %s2120_s22, 1 }
   0x9   : > { %p2650_p4 = por %p151_p2, %p150_p1  ;;  %s135_s26 = ssub.s32 %s2565_s19, %s2968_s23 }
   0xa   : > { %p2123_p6 = scmp.ge.s32.totalorder %s2569_s20, 1  ;;  %p138_p7 = scmp.eq.s32.totalorder %s135_s26, 0 }
   0xb   : > { %p2657_p8 = por %p157_p5, %p156_p3  ;;  %p217_p9 = scmp.lt.s32.totalorder %s2569_s20, 3 }
   0xc   : > { %s2663_s28 = scalar_select %p138_p7, %s2557_s17, %s140_s24  }
   0xd   : > { %p218_p10 = pnand %p2123_p6, %p217_p9 }
   0xe   : > { %p266_p11 = scmp.lt.s32.totalorder (!%p218_p10), %s2561_s18, 1  ;;  %v299_v0 = vlaneseq (!%p218_p10)  ;;  %v2571_v1 = vmov (!%p218_p10), 1983009808   ;;  %v2572_v10 = vmov (!%p218_p10), 0.0   ;;  %s2573_s12 = smov (!%p218_p10), 127   ;;  %v1982_v18 = vld [vmem:[%s2958_s3] sm:$0xff] (!%p218_p10) }
   0xf   : > { %221 = sbr.rel (%p218_p10) target bundleno = 462 (0x1ce), region = 36  ;;  %v297_v2 = vunpack.c.l.s4 (!%p218_p10), %v2571_v1  ;;  %421 = vmatprep.mubr.f32.mxu1 (!%p218_p10), %v2572_v10  ;;  %766 = vmatprep.mubr.f32.mxu0 (!%p218_p10), %v2572_v10  ;;  %s2574_s13 = smov (!%p218_p10), 126   ;;  %v1983_v19 = vld [vmem:[%s2958_s3 + $0x8] sm:$0xff] (!%p218_p10)  ;;  %v2581_v20 = vmov (!%p218_p10), 0   ;;  %vm339_vm0 = vcmask (!%p218_p10), 1039360   ;;  %vm350_vm1 = vcmask (!%p218_p10), 1043456  }
  0x10   : > { %v300_v3 = vshrl.u32 (!%p218_p10), %v299_v0, 7  ;;  %s2575_s14 = smov (!%p218_p10), 110   ;;  %s2576_s21 = smov (!%p218_p10), 109   ;;  %2488 = vset.pattern.permute.xlu0 (!%p218_p10), %v2581_v20  ;;  %2489 = vset.pattern.permute.xlu1 (!%p218_p10), %v2581_v20  ;;  %v2250_v24 = vld [vmem:[%s2957_s2 + $0x8] sm:$0xff] (!%p218_p10)   ;;  %vm686_vm2 = vcmask (!%p218_p10), 1031168   ;;  %vm343_vm3 = vcmask (!%p218_p10), 31744  }
  0x11   : > { %v298_v4 = vunpack.c.0.s8 (!%p218_p10), %v297_v2  ;;  %s2577_s22 = smov (!%p218_p10), 108   ;;  %s2578_s24 = smov (!%p218_p10), 92   ;;  %v2219_v30 = vunpack.c.l.bf16 (!%p218_p10), %v2250_v24  ;;  %v2707_v33 = vld [vmem:[%s2957_s2 + $0x10] sm:$0xff] (!%p218_p10)   ;;  %v2220_v37 = vunpack.c.h.bf16 (!%p218_p10), %v2250_v24  ;;  %v2214_v43 = vld [vmem:[%s2957_s2] sm:$0xff] (!%p218_p10)   ;;  %v2732_v44 = vld [vmem:[%s2957_s2 + $0x18] sm:$0xff] (!%p218_p10)   ;;  %vm873_vm4 = vcmask (!%p218_p10), 900096  }
  0x12   : > { %s2579_s26 = smov (!%p218_p10), 91   ;;  %v2223_v38 = vunpack.c.l.bf16 (!%p218_p10), %v2707_v33  ;;  %v2224_v42 = vunpack.c.h.bf16 (!%p218_p10), %v2707_v33  ;;  %v2215_v49 = vunpack.c.l.bf16 (!%p218_p10), %v2214_v43  ;;  %v2227_v50 = vunpack.c.l.bf16 (!%p218_p10), %v2732_v44  ;;  %v2770_v62 = vld [vmem:[%s2957_s2 + $0x20] sm:$0xff] (!%p218_p10)   ;;  %s258_s10 = sand.u32 (!%p218_p10), 1, %s2553_s16  }
  0x13   : > { %v301_v5 = vsub.s32 (!%p218_p10), %v298_v4, %v300_v3  ;;  %vm1060_vm5 = vcmask (!%p218_p10), 891904   ;;  %v2216_v58 = vunpack.c.h.bf16 (!%p218_p10), %v2214_v43  ;;  %v2228_v59 = vunpack.c.h.bf16 (!%p218_p10), %v2732_v44  ;;  %v2257_v43 = vld [vmem:[%s2957_s2 + $0x40] sm:$0xff] (!%p218_p10)  }
  0x14   : > { %v2231_v1 = vunpack.c.l.bf16 (!%p218_p10), %v2770_v62  ;;  %vm1247_vm6 = vcmask (!%p218_p10), 883712   ;;  %vm1434_vm7 = vcmask (!%p218_p10), 752640   ;;  %vm1621_vm8 = vcmask (!%p218_p10), 744448  }
  0x15   : > { %vm1808_vm9 = vcmask (!%p218_p10), 736256   ;;  %v2247_v44 = vunpack.c.l.bf16 (!%p218_p10), %v2257_v43 }
  0x16   : > { %s267_s29 = scalar_select %p266_p11, %s2561_s18, 1 }
  0x18   : > { %s2210_s30 = sshll.u32 %s267_s29, 3  ;;  %s2580_s29 = smov 90  }
  0x19   : > { %s273_s7 = scalar_lea.vmem %s2955_s0, %s2210_s30  ;;  %s2212_s8 = sadd.s32 6, %s2210_s30 }
  0x1a   : > { %v292_v6 = vld [vmem:[%s273_s7] sm:$0x3f]  ;;  %s288_s11 = scalar_lea.vmem %s2956_s1, %s2212_s8 }
  0x1b   : > { %v295_v7 = vcombine.high %v292_v6, %v292_v6  ;;  %v302_v8 = vrot.slane %v292_v6, %v301_v5  ;;  %v293_v9 = vld [vmem:[%s288_s11] sm:$0x3]  ;;  %s2378_s11 = smul.u32 48, %s258_s10 }
  0x1c   : > { %v317_v11 = vunpack.c.l.bf16 %v293_v9  ;;  %v2232_v9 = vunpack.c.h.bf16 %v2770_v62 }
  0x1d   : > { %v309_v12 = vrot.slane %v295_v7, %v301_v5  ;;  %v310_v13 = vcombine.high %v302_v8, %v302_v8  ;;  %v2681_v17 = vunpack.c.l.bf16 %v302_v8 }
  0x1e   : > { %337 = vrot.lane.b32.xlu1 %v317_v11, %s2573_s12 }
  0x1f   : > { %v2675_v14 = vunpack.c.l.bf16 %v310_v13  ;;  %v2677_v15 = vunpack.c.l.bf16 %v309_v12  ;;  %v2801_v13 = vld [vmem:[%s2957_s2 + $0x28] sm:$0xff]  }
  0x21   : > { %v2448_v16 = vpack.i.bf16 %v2677_v15, %v2675_v14 }
  0x23   : > { %2449 = vrot.lane.b32.xlu0 %v2448_v16, %s2573_s12  ;;  %2454 = vrot.lane.b32.xlu1 %v2448_v16, %s2574_s13 }
  0x27   : > { %331 = vrot.lane.b32.xlu0 %v2681_v17, %s2573_s12  ;;  %684 = vrot.lane.b32.xlu1 %v317_v11, %s2574_s13  ;;  %s260_s12 = scalar_lea.vmem [#allocation2], %s2378_s11 }
  0x2b   : > { %678 = vrot.lane.b32.xlu0 %v2681_v17, %s2574_s13  ;;  %865 = vrot.lane.b32.xlu1 %v2681_v17, %s2575_s14  ;;  %s2022_s13 = sshll.u32 %s260_s12, 4  ;;  %s2900_s13 = int_to_ptr.vmem [resolvable:$true] %s2022_s13 }
  0x2f   : > { %2459 = vrot.lane.b32.xlu0 %v2448_v16, %s2575_s14  ;;  %2464 = vrot.lane.b32.xlu1 %v2448_v16, %s2576_s21 }
  0x33   : > { %871 = vrot.lane.b32.xlu0 %v317_v11, %s2575_s14  ;;  %1058 = vrot.lane.b32.xlu1 %v317_v11, %s2576_s21  ;;  %s2379_s14 = smul.u32 768, %s2561_s18  ;;  %s2491_s18 = scalar_lea.vmem %s2900_s13, 768 }
  0x34   : > { %p2492_p12 = scmp.ne.s32.totalorder %s2900_s13, %s2491_s18 }
  0x36   : > { %p2493_p13 = pnand %p2492_p12, %p2650_p4 }
  0x37   : > { %1052 = vrot.lane.b32.xlu0 %v2681_v17, %s2576_s21  ;;  %1239 = vrot.lane.b32.xlu1 %v2681_v17, %s2577_s22 }
  0x38   : > { %p2494_p0 = pneg %p2493_p13 }
  0x3b   : > { %2469 = vrot.lane.b32.xlu0 %v2448_v16, %s2577_s22  ;;  %2474 = vrot.lane.b32.xlu1 %v2448_v16, %s2578_s24 }
  0x3f   : > { %1245 = vrot.lane.b32.xlu0 %v317_v11, %s2577_s22  ;;  %1432 = vrot.lane.b32.xlu1 %v317_v11, %s2578_s24 }
  0x43   : > { %1426 = vrot.lane.b32.xlu0 %v2681_v17, %s2578_s24  ;;  %1613 = vrot.lane.b32.xlu1 %v2681_v17, %s2579_s26  ;;  %s2905_s24 = scalar_lea.hbm %s2959_s4, %s2379_s14 }
  0x47   : > { %2479 = vrot.lane.b32.xlu0 %v2448_v16, %s2579_s26  ;;  %2484 = vrot.lane.b32.xlu1 %v2448_v16, %s2580_s29 }
  0x4b   : > { %1619 = vrot.lane.b32.xlu0 %v317_v11, %s2579_s26  ;;  %1806 = vrot.lane.b32.xlu1 %v317_v11, %s2580_s29  ;;  %s2909_s26 = scalar_lea.sflag [#allocation3], %s258_s10 }
  0x4f   : > { %1800 = vrot.lane.b32.xlu0 %v2681_v17, %s2580_s29  ;;  %1991 = vperm.xlu1 %2489, %v1983_v19   ;;  %s2582_s29 = smov [#allocation2]  }
  0x50   : > { %s2495_s30 = sshll.u32 %s2582_s29, 4  ;;  %s2496_s30 = int_to_ptr.vmem [resolvable:$false] %s2495_s30 }
  0x51   : > { %s2497_s5 = scalar_lea.vmem %s2496_s30, 1536  ;;  %p2498_p1 = scmp.lt.s32.totalorder %s2900_s13, %s2496_s30 }
  0x52   : > { %p2499_p2 = scmp.lt.s32.totalorder %s2497_s5, %s2491_s18 }
  0x53   : > { %1986 = vperm.xlu0 %2488, %v1982_v18  }
  0x54   : > { %p2500_p3 = por %p2499_p2, %p2498_p1 }
  0x56   : > { %p2501_p5 = pnand %p2500_p3, %p2494_p0 }
  0x90   : > { %v338_v21 = vpop.permute.xlu1 %337 }
  0x95   : > { %v2450_v22 = vpop.permute.xlu0 %2449  ;;  %v2455_v23 = vpop.permute.xlu1 %2454 }
  0x96   : > { %v2452_v25 = vunpack.i.h.bf16 %v2450_v22  ;;  %v2451_v26 = vunpack.i.l.bf16 %v2450_v22  ;;  %v2457_v27 = vunpack.i.h.bf16 %v2455_v23  ;;  %v2456_v28 = vunpack.i.l.bf16 %v2455_v23  ;;  %v2255_v23 = vld [vmem:[%s2957_s2 + $0x30] sm:$0xff]  }
  0x98   : > { %v341_v29 = vsel %vm339_vm0, %v2451_v26, %v2452_v25  ;;  %v688_v31 = vsel %vm686_vm2, %v2456_v28, %v2457_v27  ;;  %v342_v36 = vsel %vm339_vm0, %v2452_v25, %v338_v21  ;;  %v2236_v21 = vunpack.c.h.bf16 %v2801_v13 }
  0x99   : > { %v332_v32 = vpop.permute.xlu0 %331  ;;  %2130 = vmatprep.subr.msk.mxu1 %vm350_vm1, %v341_v29  ;;  %2146 = vmatprep.subr.msk.mxu0 %vm350_vm1, %v688_v31  ;;  %v685_v34 = vpop.permute.xlu1 %684 }
  0x9a   : > { %v340_v35 = vsel %vm339_vm0, %v332_v32, %v2451_v26  ;;  %v689_v57 = vsel %vm686_vm2, %v2457_v27, %v685_v34  ;;  %v2240_v34 = vunpack.c.h.bf16 %v2255_v23 }
  0x9b   : > { %2131 = vmatpush1.msk.msra.mxu1 %vm350_vm1, %v340_v35 }
  0x9c   : > { %2132 = vmatmul.mubr.msk.f32.vlgmr.msra.gmra.mrb[0].mxu1 %vm343_vm3, %v2219_v30  ;;  %2285 = vmatprep.subr.msk.mxu1 %vm350_vm1, %v342_v36 }
  0x9d   : > { %v679_v39 = vpop.permute.xlu0 %678  ;;  %2286 = vmatpush3.msk.msra.mxu1 %vm350_vm1, %v342_v36  ;;  %427 = vmatprep.mubr.f32.mxu1 %v2572_v10  ;;  %v866_v40 = vpop.permute.xlu1 %865  ;;  %v2256_v36 = vld [vmem:[%s2957_s2 + $0x38] sm:$0xff]  }
  0x9e   : > { %v687_v41 = vsel %vm686_vm2, %v679_v39, %v2456_v28  ;;  %2137 = vmatprep.subr.msk.mxu1 %vm350_vm1, %v2675_v14  ;;  %v2239_v28 = vunpack.c.l.bf16 %v2255_v23 }
  0x9f   : > { %2147 = vmatpush1.msk.msra.mxu0 %vm350_vm1, %v687_v41  ;;  %v2244_v41 = vunpack.c.h.bf16 %v2256_v36 }
  0xa0   : > { %2133 = vmatmul.mubr.msk.f32.gmra.mrb[2].mxu1 %vm343_vm3, %v2220_v37  ;;  %2148 = vmatmul.mubr.msk.f32.vlgmr.msra.gmra.mrb[0].mxu0 %vm343_vm3, %v2223_v38 }
  0xa1   : > { %v2460_v45 = vpop.permute.xlu0 %2459  ;;  %2287 = vmatprep.mubr.msk.f32.mxu1 %vm343_vm3, %v2219_v30  ;;  %772 = vmatprep.mubr.f32.mxu0 %v2572_v10  ;;  %v2736_v46 = vpop.permute.xlu1 %2464 }
  0xa2   : > { %v2462_v47 = vunpack.i.h.bf16 %v2460_v45  ;;  %v2461_v48 = vunpack.i.l.bf16 %v2460_v45  ;;  %v2467_v53 = vunpack.i.h.bf16 %v2736_v46  ;;  %v2466_v54 = vunpack.i.l.bf16 %v2736_v46 }
  0xa3   : > { %v2248_v46 = vunpack.c.h.bf16 %v2257_v43 }
  0xa4   : > { %2288 = vmatmul.mubr.msk.f32.vlgmr.msra.gmra.mrb[4].mxu1 %vm343_vm3, %v2220_v37  ;;  %2149 = vmatmul.mubr.msk.f32.gmra.mrb[2].mxu0 %vm343_vm3, %v2224_v42  ;;  %v874_v51 = vsel %vm873_vm4, %v866_v40, %v2461_v48  ;;  %v875_v52 = vsel %vm873_vm4, %v2461_v48, %v2462_v47  ;;  %v1062_v60 = vsel %vm1060_vm5, %v2466_v54, %v2467_v53 }
  0xa5   : > { %2138 = vmatpush1.msk.msra.mxu1 %vm350_vm1, %v2681_v17  ;;  %2155 = vmatprep.subr.msk.mxu0 %vm350_vm1, %v875_v52  ;;  %v872_v55 = vpop.permute.xlu0 %871  ;;  %v1059_v56 = vpop.permute.xlu1 %1058  ;;  %v2235_v17 = vunpack.c.l.bf16 %v2801_v13 }
  0xa6   : > { %585 = vmatprep.mubr.f32.mxu1 %v2572_v10  ;;  %2156 = vmatpush1.msk.msra.mxu0 %vm350_vm1, %v874_v51  ;;  %v876_v8 = vsel %vm873_vm4, %v2462_v47, %v872_v55  ;;  %v1063_v20 = vsel %vm1060_vm5, %v2467_v53, %v1059_v56 }
  0xa7   : > { %953 = vmatprep.mubr.f32.mxu0 %v2572_v10  ;;  %2290 = vmatprep.subr.msk.mxu1 %vm350_vm1, %v2677_v15 }
  0xa8   : > { %2139 = vmatmul.mubr.msk.f32.vlgmr.msra.gmra.mrb[0].mxu1 %vm343_vm3, %v2215_v49  ;;  %2157 = vmatmul.mubr.msk.f32.vlgmr.msra.gmra.mrb[0].mxu0 %vm343_vm3, %v2227_v50 }
  0xa9   : > { %2291 = vmatpush3.msk.msra.mxu1 %vm350_vm1, %v2677_v15  ;;  %591 = vmatprep.mubr.f32.mxu1 %v2572_v10  ;;  %v1053_v61 = vpop.permute.xlu0 %1052  ;;  %v1240_v63 = vpop.permute.xlu1 %1239 }
  0xaa   : > { %959 = vmatprep.mubr.f32.mxu0 %v2572_v10  ;;  %v1061_v0 = vsel %vm1060_vm5, %v1053_v61, %v2466_v54  ;;  %2295 = vmatprep.subr.msk.mxu1 %vm350_vm1, %v689_v57 }
  0xab   : > { %2164 = vmatprep.subr.msk.mxu0 %vm350_vm1, %v1062_v60 }
  0xac   : > { %2140 = vmatmul.mubr.msk.f32.gmra.mrb[2].mxu1 %vm343_vm3, %v2216_v58  ;;  %2158 = vmatmul.mubr.msk.f32.gmra.mrb[2].mxu0 %vm343_vm3, %v2228_v59 }
  0xad   : > { %2292 = vmatprep.mubr.msk.f32.mxu1 %vm343_vm3, %v2215_v49  ;;  %2165 = vmatpush1.msk.msra.mxu0 %vm350_vm1, %v1061_v0  ;;  %v2470_v2 = vpop.permute.xlu0 %2469  ;;  %v2783_v3 = vpop.permute.xlu1 %2474 }
  0xae   : > { %1140 = vmatprep.mubr.f32.mxu0 %v2572_v10  ;;  %v2472_v4 = vunpack.i.h.bf16 %v2470_v2  ;;  %v2471_v5 = vunpack.i.l.bf16 %v2470_v2  ;;  %v2477_v6 = vunpack.i.h.bf16 %v2783_v3  ;;  %v2476_v7 = vunpack.i.l.bf16 %v2783_v3 }
  0xb0   : > { %2293 = vmatmul.mubr.msk.f32.vlgmr.msra.gmra.mrb[4].mxu1 %vm343_vm3, %v2216_v58  ;;  %2166 = vmatmul.mubr.msk.f32.vlgmr.msra.gmra.mrb[0].mxu0 %vm343_vm3, %v2231_v1  ;;  %v1248_v11 = vsel %vm1247_vm6, %v1240_v63, %v2471_v5  ;;  %v1249_v12 = vsel %vm1247_vm6, %v2471_v5, %v2472_v4  ;;  %v1436_v15 = vsel %vm1434_vm7, %v2476_v7, %v2477_v6 }
  0xb1   : > { %2296 = vmatpush3.msk.msra.mxu1 %vm350_vm1, %v689_v57  ;;  %1146 = vmatprep.mubr.f32.mxu0 %v2572_v10  ;;  %v1246_v14 = vpop.permute.xlu0 %1245  ;;  %v1433_v16 = vpop.permute.xlu1 %1432 }
  0xb2   : > { %2300 = vmatprep.subr.msk.mxu1 %vm350_vm1, %v876_v8  ;;  %2173 = vmatprep.subr.msk.mxu0 %vm350_vm1, %v1249_v12  ;;  %v1250_v32 = vsel %vm1247_vm6, %v2472_v4, %v1246_v14  ;;  %v1437_v40 = vsel %vm1434_vm7, %v2477_v6, %v1433_v16 }
  0xb3   : > { %2297 = vmatprep.mubr.msk.f32.mxu1 %vm343_vm3, %v2223_v38  ;;  %2174 = vmatpush1.msk.msra.mxu0 %vm350_vm1, %v1248_v11  ;;  %v2243_v38 = vunpack.c.l.bf16 %v2256_v36 }
  0xb4   : > { %2167 = vmatmul.mubr.msk.f32.gmra.mrb[2].mxu0 %vm343_vm3, %v2232_v9  ;;  %2182 = vmatprep.subr.msk.mxu0 %vm350_vm1, %v1436_v15 }
  0xb5   : > { %1327 = vmatprep.mubr.f32.mxu0 %v2572_v10  ;;  %v1427_v18 = vpop.permute.xlu0 %1426  ;;  %v1614_v19 = vpop.permute.xlu1 %1613 }
  0xb6   : > { %v1435_v22 = vsel %vm1434_vm7, %v1427_v18, %v2476_v7 }
  0xb8   : > { %2298 = vmatmul.mubr.msk.f32.vlgmr.msra.gmra.mrb[4].mxu1 %vm343_vm3, %v2224_v42  ;;  %2175 = vmatmul.mubr.msk.f32.vlgmr.msra.gmra.mrb[0].mxu0 %vm343_vm3, %v2235_v17 }
  0xb9   : > { %2301 = vmatpush3.msk.msra.mxu1 %vm350_vm1, %v876_v8  ;;  %1333 = vmatprep.mubr.f32.mxu0 %v2572_v10  ;;  %v2480_v24 = vpop.permute.xlu0 %2479  ;;  %v2485_v27 = vpop.permute.xlu1 %2484 }
  0xba   : > { %2305 = vmatprep.subr.msk.mxu1 %vm350_vm1, %v1063_v20  ;;  %2302 = vmatprep.mubr.msk.f32.mxu1 %vm343_vm3, %v2227_v50  ;;  %v2482_v25 = vunpack.i.h.bf16 %v2480_v24  ;;  %v2481_v26 = vunpack.i.l.bf16 %v2480_v24  ;;  %v2487_v30 = vunpack.i.h.bf16 %v2485_v27  ;;  %v2486_v31 = vunpack.i.l.bf16 %v2485_v27 }
  0xbb   : > { %2183 = vmatpush1.msk.msra.mxu0 %vm350_vm1, %v1435_v22 }
  0xbc   : > { %2176 = vmatmul.mubr.msk.f32.gmra.mrb[2].mxu0 %vm343_vm3, %v2236_v21  ;;  %v1623_v29 = vsel %vm1621_vm8, %v2481_v26, %v2482_v25  ;;  %v1622_v35 = vsel %vm1621_vm8, %v1614_v19, %v2481_v26  ;;  %v1810_v37 = vsel %vm1808_vm9, %v2486_v31, %v2487_v30 }
  0xbd   : > { %1514 = vmatprep.mubr.f32.mxu0 %v2572_v10  ;;  %2191 = vmatprep.subr.msk.mxu0 %vm350_vm1, %v1623_v29  ;;  %v1620_v33 = vpop.permute.xlu0 %1619  ;;  %v1807_v47 = vpop.permute.xlu1 %1806 }
  0xbe   : > { %v1624_v45 = vsel %vm1621_vm8, %v2482_v25, %v1620_v33  ;;  %v1811_v48 = vsel %vm1808_vm9, %v2487_v30, %v1807_v47 }
  0xc0   : > { %2303 = vmatmul.mubr.msk.f32.vlgmr.msra.gmra.mrb[4].mxu1 %vm343_vm3, %v2228_v59  ;;  %2184 = vmatmul.mubr.msk.f32.vlgmr.msra.gmra.mrb[0].mxu0 %vm343_vm3, %v2239_v28 }
  0xc1   : > { %2306 = vmatpush3.msk.msra.mxu1 %vm350_vm1, %v1063_v20  ;;  %1520 = vmatprep.mubr.f32.mxu0 %v2572_v10  ;;  %v1801_v39 = vpop.permute.xlu0 %1800 }
  0xc2   : > { %2310 = vmatprep.subr.msk.mxu1 %vm350_vm1, %v1250_v32  ;;  %2307 = vmatprep.mubr.msk.f32.mxu1 %vm343_vm3, %v2231_v1  ;;  %v1809_v42 = vsel %vm1808_vm9, %v1801_v39, %v2486_v31 }
  0xc3   : > { %2192 = vmatpush1.msk.msra.mxu0 %vm350_vm1, %v1622_v35 }
  0xc4   : > { %2185 = vmatmul.mubr.msk.f32.gmra.mrb[2].mxu0 %vm343_vm3, %v2240_v34  ;;  %2200 = vmatprep.subr.msk.mxu0 %vm350_vm1, %v1810_v37 }
  0xc5   : > { %1701 = vmatprep.mubr.f32.mxu0 %v2572_v10 }
  0xc8   : > { %2308 = vmatmul.mubr.msk.f32.vlgmr.msra.gmra.mrb[4].mxu1 %vm343_vm3, %v2232_v9  ;;  %2193 = vmatmul.mubr.msk.f32.vlgmr.msra.gmra.mrb[0].mxu0 %vm343_vm3, %v2243_v38 }
  0xc9   : > { %2311 = vmatpush3.msk.msra.mxu1 %vm350_vm1, %v1250_v32  ;;  %1707 = vmatprep.mubr.f32.mxu0 %v2572_v10 }
  0xca   : > { %2315 = vmatprep.subr.msk.mxu1 %vm350_vm1, %v1437_v40  ;;  %2312 = vmatprep.mubr.msk.f32.mxu1 %vm343_vm3, %v2235_v17 }
  0xcb   : > { %2201 = vmatpush1.msk.msra.mxu0 %vm350_vm1, %v1809_v42 }
  0xcc   : > { %2194 = vmatmul.mubr.msk.f32.gmra.mrb[2].mxu0 %vm343_vm3, %v2244_v41 }
  0xcd   : > { %1888 = vmatprep.mubr.f32.mxu0 %v2572_v10 }
  0xce   : > { %v1992_v60 = vpop.permute.xlu1 %1991 }
  0xd0   : > { %2313 = vmatmul.mubr.msk.f32.vlgmr.msra.gmra.mrb[4].mxu1 %vm343_vm3, %v2236_v21  ;;  %2202 = vmatmul.mubr.msk.f32.vlgmr.msra.gmra.mrb[0].mxu0 %vm343_vm3, %v2247_v44 }
  0xd1   : > { %2316 = vmatpush3.msk.msra.mxu1 %vm350_vm1, %v1437_v40  ;;  %1894 = vmatprep.mubr.f32.mxu0 %v2572_v10 }
  0xd2   : > { %2320 = vmatprep.subr.msk.mxu1 %vm350_vm1, %v1624_v45  ;;  %2317 = vmatprep.mubr.msk.f32.mxu1 %vm343_vm3, %v2239_v28  ;;  %v1987_v53 = vpop.permute.xlu0 %1986 }
  0xd4   : > { %2203 = vmatmul.mubr.msk.f32.gmra.mrb[2].mxu0 %vm343_vm3, %v2248_v46 }
  0xd8   : > { %2318 = vmatmul.mubr.msk.f32.vlgmr.msra.gmra.mrb[4].mxu1 %vm343_vm3, %v2240_v34 }
  0xd9   : > { %2321 = vmatpush3.msk.msra.mxu1 %vm350_vm1, %v1624_v45  ;;  %2322 = vmatprep.mubr.msk.f32.mxu1 %vm343_vm3, %v2243_v38 }
  0xda   : > { %2325 = vmatprep.subr.msk.mxu1 %vm350_vm1, %v1811_v48 }
  0xe0   : > { %2323 = vmatmul.mubr.msk.f32.vlgmr.msra.gmra.mrb[4].mxu1 %vm343_vm3, %v2244_v41 }
  0xe1   : > { %2326 = vmatpush3.msk.msra.mxu1 %vm350_vm1, %v1811_v48  ;;  %2327 = vmatprep.mubr.msk.f32.mxu1 %vm343_vm3, %v2247_v44 }
  0xe8   : > { %2328 = vmatmul.mubr.msk.f32.vlgmr.msra.gmra.mrb[4].mxu1 %vm343_vm3, %v2248_v46 }
 0x17b   : > { %v587_v10 = vpop.f32.mrb[0].mxu1 }
 0x17c   : > { %v589_v49 = vpop.f32.mrb[1].mxu1 }
 0x17f   : > { %v593_v50 = vpop.f32.mrb[2].mxu1 }
 0x180   : > { %v595_v51 = vpop.f32.mrb[3].mxu1 }
 0x1a3   : > { %v1890_v52 = vpop.f32.mrb[0].mxu0 }
 0x1a4   : > { %v2330_v54 = vadd.f32 %v1890_v52, %v587_v10  ;;  %v1892_v55 = vpop.f32.mrb[1].mxu0 }
 0x1a5   : > { %v2331_v56 = vadd.f32 %v1892_v55, %v589_v49 }
 0x1a6   : > { %v1994_v57 = vadd.f32 %v2330_v54, %v1987_v53 }
 0x1a7   : > { %v1995_v58 = vadd.f32 %v2331_v56, %v1987_v53  ;;  %v1896_v59 = vpop.f32.mrb[2].mxu0 }
 0x1a8   : > { %2000 = vst [vmem:[%s260_s12] sm:$0xff] %v1994_v57  ;;  %v2332_v61 = vadd.f32 %v1896_v59, %v593_v50  ;;  %v1898_v62 = vpop.f32.mrb[3].mxu0 }
 0x1a9   : > { %2001 = vst [vmem:[%s260_s12 + $0x8] sm:$0xff] %v1995_v58  ;;  %v2333_v63 = vadd.f32 %v1898_v62, %v595_v51 }
 0x1aa   : > { %v1997_v0 = vadd.f32 %v2332_v61, %v1992_v60 }
 0x1ab   : > { %v1998_v1 = vadd.f32 %v2333_v63, %v1992_v60 }
 0x1ac   : > { %2003 = vst [vmem:[%s260_s12 + $0x18] sm:$0xff] %v1997_v0 }
 0x1ad   : > { %2004 = vst [vmem:[%s260_s12 + $0x20] sm:$0xff] %v1998_v1 }
 0x1bb   : > { %v2329_v2 = vpop.f32.mrb[4].mxu1 }
 0x1bc   : > { %v1999_v3 = vadd.f32 %v2329_v2, %v1992_v60  ;;  %v1967_v4 = vpop.f32.mrb[5].mxu1 }
 0x1bd   : > { %v1996_v5 = vadd.f32 %v1987_v53, %v1967_v4 }
 0x1be   : > { %2005 = vst [vmem:[%s260_s12 + $0x28] sm:$0xff] %v1999_v3 }
 0x1bf   : > { %2002 = vst [vmem:[%s260_s12 + $0x10] sm:$0xff] %v1996_v5 }
 0x1c0   : > { %2504 = shalt.err (!%p2501_p5)
}
 0x1c1   : > { %s2505_s6 = scalar_lea.hbm %s2905_s24, 768  ;;  %s2509_s9 = scalar_lea.hbm %s2959_s4, 1536 }
 0x1c2   : > { %p2506_p6 = scmp.ne.s32.totalorder %s2905_s24, %s2505_s6  ;;  %p2510_p10 = scmp.lt.u32.totalorder %s2905_s24, %s2959_s4 }
 0x1c3   : > { %p2511_p11 = scmp.lt.u32.totalorder %s2509_s9, %s2505_s6  ;;  %p2513_p13 = scmp.lt.u32.totalorder %s2505_s6, %s2905_s24 }
 0x1c4   : > { %p2507_p7 = pnand %p2506_p6, %p2650_p4 }
 0x1c5   : > { %p2512_p12 = por %p2511_p11, %p2510_p10 }
 0x1c6   : > { %p2508_p9 = pneg %p2507_p7 }
 0x1c7   : > { %p2514_p0 = por %p2513_p13, %p2512_p12 }
 0x1c9   : > { %p2515_p1 = pnand %p2514_p0, %p2508_p9 }
 0x1cb   : > { %2518 = shalt.err (!%p2515_p1)
}
 0x1cc   : > { %s2583_s12 = smov 384   ;;  %s2584_s14 = smov 24  }
 0x1cd   : > { %2380 = dma.vmem_to_hbm [thread:$0]  (%p2650_p4), %s2900_s13, 768, %s2905_s24, %s2909_s26, %s2583_s12, %s2583_s12, %s2584_s14  }
 0x1ce PF: > { %p2386_p2 = scmp.ge.s32.totalorder %s2569_s20, 2  ;;  %s2037_s21 = sand.u32 1, %s2549_s15  }
 0x1cf   : > { %s2038_s22 = scalar_lea.sflag [#allocation3], %s2037_s21 }
 0x1d0   : > { %p2383_p3 = pnand %p2386_p2, %p2657_p8 }
 0x1d2   : > { %2544 = dma.done.wait (!%p2383_p3), %s2038_s22, 768  }
 0x1d3   : > { %2546 = vsyncadd (!%p2383_p3), %s2038_s22, 4294966528  ;;  %s17_s20 = sadd.s32 1, %s2569_s20   ;;  %s2962_s15 = smov %s2553_s16 }
 0x1d4   : > { %p14_p5 = scmp.ge.s32.totalorder %s17_s20, 4   ;;  %s2963_s16 = smov %s2557_s17 }
 0x1d5   : > { %s2964_s17 = smov %s2663_s28  ;;  %s2965_s18 = smov %s2565_s19 }
 0x1d6   : > { %s2966_s19 = smov %s2968_s23  ;;  %16 = sbr.rel (!%p14_p5) target bundleno = 4 (0x4), region = 82 }
 0x1dd   :  { %2043 = vsyncpa [#allocation3], 1 }
 0x1de   :  { %2045 = vsyncpa [#allocation3 + $0x1], 1 }

</bundles_post_ra>
